<compile_context>
chip_gen: v6e
topology: v6e:2x2x1
jax: 0.10.0
libtpu: 0.0.40
codegen_flags: <defaults>
</compile_context>

<pallas_src>
import jax
import jax.numpy as jnp
from jax.experimental import pallas as pl
from jax.experimental.pallas import tpu as pltpu

LANE = 128  # TPU lane width; weight slab lanes are padded to a multiple of this.


def _round_up(n, m):
    return ((n + m - 1) // m) * m


def _choose_tile_b(bsz):
    # Small batches: one tile whose block shape equals the full batch dim (always legal).
    if bsz < 32:
        return bsz
    # >= 2 tiles so a v7x megacore can split the "parallel" batch axis across both
    # TensorCores; the 1024-row cap amortizes per-step overhead on single-core v5e/v6e
    # while keeping double-buffered tiles far under v5e's 16 MiB default scoped VMEM.
    return min(1024, _round_up(pl.cdiv(bsz, 2), 16))


def _mlp_kernel(x_ref, w_ref, b_ref, o_ref):
    """Fused fc1 -> tanh -> fc2 -> tanh -> out on one (tile_b, F) batch tile.

    x_ref: (tile_b, F)  activations at native feature width, compute dtype (f32/bf16).
    w_ref: (3, D, D)    lane-padded weight slab (layer i in w_ref[i]; pad rows/cols zero).
    b_ref: (3, 1, D)    f32 bias slab (pad lanes zero).
    o_ref: (tile_b, A)  f32 output at native action width.
    """
    f_in = x_ref.shape[1]
    n_act = o_ref.shape[1]
    cdt = w_ref.dtype                          # MXU input dtype (bf16 or f32)
    x = x_ref[...]

    # Layer 1: only the first f_in rows of the padded weight tile are real.
    w0 = w_ref[0]
    z = jnp.dot(x, w0[:f_in, :], preferred_element_type=jnp.float32) + b_ref[0]
    # tanh kept in f32 (v5e has no bf16 EUP); cast back for the next MXU pass.
    h = jnp.tanh(z).astype(cdt)

    # Layer 2: padded lanes of h are exactly zero (zero weight cols + zero bias, tanh(0)=0).
    z = jnp.dot(h, w_ref[1], preferred_element_type=jnp.float32) + b_ref[1]
    h = jnp.tanh(z).astype(cdt)

    # Output layer (no activation): store only the real action lanes (narrow masked vst).
    z = jnp.dot(h, w_ref[2], preferred_element_type=jnp.float32) + b_ref[2]
    o_ref[...] = z[:, :n_act].astype(o_ref.dtype)


def pack_params(params, compute_dtype=jnp.bfloat16):
    """Pack per-layer weights/biases into lane-padded slabs (done once, off the hot path).

    Returns:
      w_slab: (3, D, D) compute_dtype, zero-padded.
      b_slab: (3, 1, D) float32, zero-padded (biases added post-f32-accumulation).
    """
    w1, b1 = params["w1"], params["b1"]    # (F, H), (1, H)
    w2, b2 = params["w2"], params["b2"]    # (H, H), (1, H)
    w3, b3 = params["w3"], params["b3"]    # (H, A), (1, A)
    f_in, hidden = w1.shape
    actions = w3.shape[1]
    d = _round_up(max(f_in, hidden, actions), LANE)

    w_slab = jnp.zeros((3, d, d), compute_dtype)
    w_slab = w_slab.at[0, :f_in, :hidden].set(w1.astype(compute_dtype))
    w_slab = w_slab.at[1, :hidden, :hidden].set(w2.astype(compute_dtype))
    w_slab = w_slab.at[2, :hidden, :actions].set(w3.astype(compute_dtype))

    b_slab = jnp.zeros((3, 1, d), jnp.float32)
    b_slab = b_slab.at[0, 0, :hidden].set(b1.reshape(-1).astype(jnp.float32))
    b_slab = b_slab.at[1, 0, :hidden].set(b2.reshape(-1).astype(jnp.float32))
    b_slab = b_slab.at[2, 0, :actions].set(b3.reshape(-1).astype(jnp.float32))
    return w_slab, b_slab


def linear_map_net(x, w_slab, b_slab, env_actions, *, tile_b=None):
    """x: [B, F] (native shape). w_slab/b_slab from pack_params. Returns [B, env_actions] f32."""
    bsz, f_in = x.shape
    d = w_slab.shape[-1]
    cdt = w_slab.dtype
    hidden = 64  # LinearMapNet's fixed hidden width (used only for the advisory cost estimate)

    if tile_b is None:
        tile_b = _choose_tile_b(bsz)
    if tile_b >= bsz:
        tile_b = bsz                           # single tile; block == full batch dim (legal)
    else:
        tile_b = max(16, _round_up(tile_b, 16))  # sublane-friendly for both f32 and bf16
    grid = pl.cdiv(bsz, tile_b)                # partial last tile handled by Pallas masking

    # Only cast (no padding copy). For bf16 this halves the x DMA; for f32 it's a no-op.
    x_c = x if x.dtype == cdt else x.astype(cdt)

    itemsize = jnp.dtype(cdt).itemsize
    cost = pl.CostEstimate(
        flops=2 * bsz * (f_in * hidden + hidden * hidden + hidden * env_actions),
        transcendentals=2 * bsz * hidden,
        bytes_accessed=(bsz * f_in * itemsize          # x
                        + w_slab.size * itemsize       # weight slab
                        + b_slab.size * 4              # biases (f32)
                        + bsz * env_actions * 4),      # output (f32)
    )

    out = pl.pallas_call(
        _mlp_kernel,
        out_shape=jax.ShapeDtypeStruct((bsz, env_actions), jnp.float32),
        grid=(grid,),
        in_specs=[
            pl.BlockSpec((tile_b, f_in), lambda i: (i, 0)),   # x: batch-tiled, pipelined
            pl.BlockSpec((3, d, d), lambda i: (0, 0, 0)),     # weights: VMEM-resident
            pl.BlockSpec((3, 1, d), lambda i: (0, 0, 0)),     # biases:  VMEM-resident
        ],
        out_specs=pl.BlockSpec((tile_b, env_actions), lambda i: (i, 0)),
        compiler_params=pltpu.CompilerParams(
            # Batch tiles are independent -> megacore-shardable on v7x.
            dimension_semantics=("parallel",),
        ),
        cost_estimate=cost,
    )(x_c, w_slab, b_slab)
    return out


def init_params(key, input_shape, env_actions):
    """Deterministic init mimicking nn.Linear's U(-1/sqrt(fan_in), 1/sqrt(fan_in)).
    Weights stored as [in, out] (transposed relative to PyTorch)."""
    ks = jax.random.split(key, 6)

    def linear(kw, kb, fan_in, fan_out):
        bound = 1.0 / jnp.sqrt(jnp.float32(fan_in))
        w = jax.random.uniform(kw, (fan_in, fan_out), jnp.float32, -bound, bound)
        b = jax.random.uniform(kb, (1, fan_out), jnp.float32, -bound, bound)
        return w, b

    w1, b1 = linear(ks[0], ks[1], input_shape, 64)
    w2, b2 = linear(ks[2], ks[3], 64, 64)
    w3, b3 = linear(ks[4], ks[5], 64, env_actions)
    return {"w1": w1, "b1": b1, "w2": w2, "b2": b2, "w3": w3, "b3": b3}


def reference(x, p):
    h1 = jnp.tanh(x @ p["w1"] + p["b1"])
    h2 = jnp.tanh(h1 @ p["w2"] + p["b2"])
    return h2 @ p["w3"] + p["b3"]


if __name__ == "__main__":
    key = jax.random.PRNGKey(0)
    k_x, k_p, k_big = jax.random.split(key, 3)

    batch = 8
    input_shape = 32     # flattened observation vector
    env_actions = 4

    x = jax.random.normal(k_x, (batch, input_shape), jnp.float32)
    params = init_params(k_p, input_shape, env_actions)
    ref = reference(x, params)

    # --- f32 path (tight tolerance) ---
    w_f32, b_f32 = pack_params(params, jnp.float32)
    out = jax.block_until_ready(linear_map_net(x, w_f32, b_f32, env_actions))
    assert out.shape == (batch, env_actions)
    assert jnp.allclose(out, ref, atol=1e-4, rtol=1e-4), "f32 mismatch vs reference"

    # --- bf16 path (default: MXU-native operands, f32 accumulation / bias / tanh) ---
    w_bf16, b_bf16 = pack_params(params)   # default compute dtype = bf16
    out_bf = jax.block_until_ready(linear_map_net(x, w_bf16, b_bf16, env_actions))
    assert out_bf.shape == (batch, env_actions)
    assert jnp.allclose(out_bf, ref, atol=5e-2, rtol=5e-2), "bf16 mismatch vs reference"

    # --- multi-tile grid with a partial last tile (batch not a multiple of tile_b) ---
    x_big = jax.random.normal(k_big, (100, input_shape), jnp.float32)
    ref_big = reference(x_big, params)

    out_big = jax.block_until_ready(
        linear_map_net(x_big, w_f32, b_f32, env_actions))          # heuristic: 2 tiles of 64
    assert out_big.shape == (100, env_actions)
    assert jnp.allclose(out_big, ref_big, atol=1e-4, rtol=1e-4), "multi-tile mismatch"

    out_big2 = jax.block_until_ready(
        linear_map_net(x_big, w_bf16, b_bf16, env_actions, tile_b=32))  # 4 tiles, partial last
    assert out_big2.shape == (100, env_actions)
    assert jnp.allclose(out_big2, ref_big, atol=5e-2, rtol=5e-2), "partial-tile mismatch"

    print("KERNEL_OK")
</pallas_src>

<mosaic_0001>
module attributes {stable_mosaic.version = 11 : i64} {
  func.func @_mlp_kernel(%arg0: i32, %arg1: memref<8x32xf32, #tpu.memory_space<vmem>>, %arg2: memref<3x128x128xf32, #tpu.memory_space<vmem>>, %arg3: memref<3x1x128xf32, #tpu.memory_space<vmem>>, %arg4: memref<8x4xf32, #tpu.memory_space<vmem>>) attributes {dimension_semantics = [#tpu.dimension_semantics<parallel>], iteration_bounds = array<i64: 1>, scalar_prefetch = 0 : i64, scratch_operands = 0 : i64, tpu.core_type = #tpu.core_type<tc>, window_params = [{transform_indices = @transform_0, window_bounds = array<i64: 8, 32>}, {pipeline_mode = #tpu.pipeline_mode<synchronous>, transform_indices = @transform_1, window_bounds = array<i64: 3, 128, 128>}, {pipeline_mode = #tpu.pipeline_mode<synchronous>, transform_indices = @transform_2, window_bounds = array<i64: 3, 1, 128>}, {transform_indices = @transform_3, window_bounds = array<i64: 8, 4>}]} {
    %c0 = arith.constant 0 : index
    %c0_0 = arith.constant 0 : index
    %0 = vector.load %arg1[%c0, %c0_0] : memref<8x32xf32, #tpu.memory_space<vmem>>, vector<8x32xf32>
    %c0_1 = arith.constant 0 : index
    %c0_2 = arith.constant 0 : index
    %c0_3 = arith.constant 0 : index
    %1 = vector.load %arg2[%c0_1, %c0_2, %c0_3] : memref<3x128x128xf32, #tpu.memory_space<vmem>>, vector<1x128x128xf32>
    %2 = vector.shape_cast %1 : vector<1x128x128xf32> to vector<128x128xf32>
    %3 = vector.extract_strided_slice %2 {offsets = [0, 0], sizes = [32, 128], strides = [1, 1]} : vector<128x128xf32> to vector<32x128xf32>
    %cst = arith.constant dense<0.000000e+00> : vector<8x128xf32>
    %4 = tpu.matmul %0, %3, %cst {dimension_numbers = #tpu.dot_dimension_numbers<[1], [0], [0], [1], [0, 0, 1, 1], [], []>} : vector<8x32xf32>, vector<32x128xf32>, vector<8x128xf32> -> vector<8x128xf32>
    %c0_4 = arith.constant 0 : index
    %c0_5 = arith.constant 0 : index
    %c0_6 = arith.constant 0 : index
    %5 = vector.load %arg3[%c0_4, %c0_5, %c0_6] : memref<3x1x128xf32, #tpu.memory_space<vmem>>, vector<1x1x128xf32>
    %6 = vector.shape_cast %5 : vector<1x1x128xf32> to vector<1x128xf32>
    %7 = vector.broadcast %6 : vector<1x128xf32> to vector<8x128xf32>
    %8 = arith.addf %4, %7 : vector<8x128xf32>
    %9 = math.tanh %8 : vector<8x128xf32>
    %c1 = arith.constant 1 : index
    %c0_7 = arith.constant 0 : index
    %c0_8 = arith.constant 0 : index
    %10 = vector.load %arg2[%c1, %c0_7, %c0_8] : memref<3x128x128xf32, #tpu.memory_space<vmem>>, vector<1x128x128xf32>
    %11 = vector.shape_cast %10 : vector<1x128x128xf32> to vector<128x128xf32>
    %cst_9 = arith.constant dense<0.000000e+00> : vector<8x128xf32>
    %12 = tpu.matmul %9, %11, %cst_9 {dimension_numbers = #tpu.dot_dimension_numbers<[1], [0], [0], [1], [0, 0, 1, 1], [], []>} : vector<8x128xf32>, vector<128x128xf32>, vector<8x128xf32> -> vector<8x128xf32>
    %c1_10 = arith.constant 1 : index
    %c0_11 = arith.constant 0 : index
    %c0_12 = arith.constant 0 : index
    %13 = vector.load %arg3[%c1_10, %c0_11, %c0_12] : memref<3x1x128xf32, #tpu.memory_space<vmem>>, vector<1x1x128xf32>
    %14 = vector.shape_cast %13 : vector<1x1x128xf32> to vector<1x128xf32>
    %15 = vector.broadcast %14 : vector<1x128xf32> to vector<8x128xf32>
    %16 = arith.addf %12, %15 : vector<8x128xf32>
    %17 = math.tanh %16 : vector<8x128xf32>
    %c2 = arith.constant 2 : index
    %c0_13 = arith.constant 0 : index
    %c0_14 = arith.constant 0 : index
    %18 = vector.load %arg2[%c2, %c0_13, %c0_14] : memref<3x128x128xf32, #tpu.memory_space<vmem>>, vector<1x128x128xf32>
    %19 = vector.shape_cast %18 : vector<1x128x128xf32> to vector<128x128xf32>
    %cst_15 = arith.constant dense<0.000000e+00> : vector<8x128xf32>
    %20 = tpu.matmul %17, %19, %cst_15 {dimension_numbers = #tpu.dot_dimension_numbers<[1], [0], [0], [1], [0, 0, 1, 1], [], []>} : vector<8x128xf32>, vector<128x128xf32>, vector<8x128xf32> -> vector<8x128xf32>
    %c2_16 = arith.constant 2 : index
    %c0_17 = arith.constant 0 : index
    %c0_18 = arith.constant 0 : index
    %21 = vector.load %arg3[%c2_16, %c0_17, %c0_18] : memref<3x1x128xf32, #tpu.memory_space<vmem>>, vector<1x1x128xf32>
    %22 = vector.shape_cast %21 : vector<1x1x128xf32> to vector<1x128xf32>
    %23 = vector.broadcast %22 : vector<1x128xf32> to vector<8x128xf32>
    %24 = arith.addf %20, %23 : vector<8x128xf32>
    %25 = vector.extract_strided_slice %24 {offsets = [0, 0], sizes = [8, 4], strides = [1, 1]} : vector<8x128xf32> to vector<8x4xf32>
    %c0_19 = arith.constant 0 : index
    %c0_20 = arith.constant 0 : index
    %26 = vector.load %arg4[%c0_19, %c0_20] : memref<8x4xf32, #tpu.memory_space<vmem>>, vector<8x4xf32>
    tpu.vector_store %arg4[%c0_19, %c0_20], %25 {strides = array<i32>} : memref<8x4xf32, #tpu.memory_space<vmem>>, vector<8x4xf32>,
    return
  }
  func.func @transform_0(%arg0: i32) -> (i32, i32) {
    %c0_i32 = arith.constant 0 : i32
    %c0_i32_0 = arith.constant 0 : i32
    return %arg0, %c0_i32 : i32, i32
  }
  func.func @transform_1(%arg0: i32) -> (i32, i32, i32) {
    %c0_i32 = arith.constant 0 : i32
    %c0_i32_0 = arith.constant 0 : i32
    %c0_i32_1 = arith.constant 0 : i32
    %c0_i32_2 = arith.constant 0 : i32
    return %c0_i32, %c0_i32_0, %c0_i32_1 : i32, i32, i32
  }
  func.func @transform_2(%arg0: i32) -> (i32, i32, i32) {
    %c0_i32 = arith.constant 0 : i32
    %c0_i32_0 = arith.constant 0 : i32
    %c0_i32_1 = arith.constant 0 : i32
    %c0_i32_2 = arith.constant 0 : i32
    return %c0_i32, %c0_i32_0, %c0_i32_1 : i32, i32, i32
  }
  func.func @transform_3(%arg0: i32) -> (i32, i32) {
    %c0_i32 = arith.constant 0 : i32
    %c0_i32_0 = arith.constant 0 : i32
    return %arg0, %c0_i32 : i32, i32
  }
}

</mosaic_0001>

<bundles_post_ra>
// kernel: tpu_custom_call.1
= control target key start
LH: loop header
LB: loop body
LE: loop exit
PB: predicated region body
PF: predicated region fallthrough
CT: control target
= control target key end

     0   :  { %8 = vsyncpa [#allocation3], 0  ;;  %s592_s0 = inlined_call_operand.hbm [shape: f32[8,32], index: 0, kind: input, shape index: {}]   ;;  %s593_s1 = inlined_call_operand.hbm [shape: f32[3,128,128], index: 1, kind: input, shape index: {}]   ;;  %s594_s2 = inlined_call_operand.vmem [shape: f32[3,1,128], index: 2, kind: input, shape index: {}]   ;;  %s595_s3 = inlined_call_operand.vmem [shape: f32[8,4], index: 3, kind: output, shape index: {}]  }
   0x1   :  { %9 = vsyncpa [#allocation5], 0  ;;  %s506_s12 = smov [#allocation2]   ;;  %s507_s14 = smov [#allocation4]  }
   0x2   :  { %s16_s13 = sshll.u32 %s506_s12, 4  ;;  %s25_s15 = sshll.u32 %s507_s14, 4  ;;  %s17_s13 = int_to_ptr.vmem [resolvable:$true] %s16_s13  ;;  %s26_s15 = int_to_ptr.vmem [resolvable:$true] %s25_s15 }
   0x3   :  { %s470_s16 = scalar_lea.vmem %s17_s13, 128  ;;  %p475_p1 = scmp.lt.s32.totalorder %s17_s13, %s17_s13 }
   0x4   :  { %p471_p0 = scmp.ne.s32.totalorder %s17_s13, %s470_s16  ;;  %p476_p2 = scmp.lt.s32.totalorder %s470_s16, %s470_s16 }
   0x6   :  { %p477_p3 = por %p476_p2, %p475_p1 }
   0x8   :  { %p478_p4 = pnand %p477_p3, %p471_p0 }
   0xa   :  { %481 = shalt.err (!%p478_p4)
}
   0xb   :  { %19 = dma.hbm_to_vmem [thread:$0]  %s592_s0, 128, %s17_s13, [#allocation3]  }
   0xc   :  { %s490_s19 = scalar_lea.vmem %s26_s15, 6144  ;;  %p495_p6 = scmp.lt.s32.totalorder %s26_s15, %s26_s15 }
   0xd   :  { %p491_p5 = scmp.ne.s32.totalorder %s26_s15, %s490_s19  ;;  %p496_p7 = scmp.lt.s32.totalorder %s490_s19, %s490_s19 }
   0xf   :  { %p497_p8 = por %p496_p7, %p495_p6 }
  0x11   :  { %p498_p9 = pnand %p497_p8, %p491_p5 }
  0x13   :  { %501 = shalt.err (!%p498_p9)
}
  0x14   :  { %s508_s20 = smov 128   ;;  %s509_s21 = smov 8  }
  0x15   :  { %31 = dma.hbm_to_vmem [thread:$0]  %s593_s1, 6144, %s26_s15, [#allocation5], %s508_s20, %s508_s20, %s509_s21  }
  0x16   :  { %502 = dma.done.wait [#allocation3], 128  }
  0x17   :  { %503 = vsyncadd [#allocation3], 4294967168 }
  0x18   :  { %504 = dma.done.wait [#allocation5], 6144  }
  0x19   :  { %505 = vsyncadd [#allocation5], 4294961152  ;;  %v510_v0 = vmov 0.0   ;;  %vm511_vm0 = vmmov 0   ;;  %v44_v1 = vld [vmem:[#allocation4 + $0x18] sm:$0xff]  ;;  %v43_v2 = vld [vmem:[#allocation4 + $0x10] sm:$0xff] }
  0x1a   :  { %371 = vmatprep.subr.mxu0 %v510_v0  ;;  %379 = vmatprep.mubr.msk.f32.mxu0 %vm511_vm0, %v510_v0  ;;  %v143_v3 = vld [vmem:[#allocation4 + $0xf8] sm:$0xff]  ;;  %v42_v4 = vld [vmem:[#allocation4 + $0x8] sm:$0xff]  ;;  %v142_v5 = vld [vmem:[#allocation4 + $0xf0] sm:$0xff]  ;;  %vm52_vm1 = vcmask 261120   ;;  %vm318_vm2 = vcmask 31744  }
  0x1b   :  { %382 = vmatprep.subr.mxu1 %v510_v0  ;;  %414 = vmatprep.mubr.msk.f32.mxu1 %vm511_vm0, %v510_v0  ;;  %v141_v6 = vld [vmem:[#allocation4 + $0xe8] sm:$0xff]  ;;  %v41_v7 = vld [vmem:[#allocation4] sm:$0xff]  ;;  %v40_v8 = vld [vmem:[#allocation2] sm:$0xff] }
  0x1c   :  { %372 = vmatpush3.msra.mxu0 %v44_v1  ;;  %383 = vmatpush3.msra.mxu1 %v143_v3  ;;  %v140_v9 = vld [vmem:[#allocation4 + $0xe0] sm:$0xff]  ;;  %v139_v10 = vld [vmem:[#allocation4 + $0xd8] sm:$0xff]  ;;  %v138_v11 = vld [vmem:[#allocation4 + $0xd0] sm:$0xff] }
  0x1d   :  { %373 = vmatprep.subr.mxu0 %v510_v0  ;;  %384 = vmatprep.subr.mxu1 %v510_v0  ;;  %v137_v12 = vld [vmem:[#allocation4 + $0xc8] sm:$0xff]  ;;  %v136_v13 = vld [vmem:[#allocation4 + $0xc0] sm:$0xff]  ;;  %v135_v14 = vld [vmem:[#allocation4 + $0xb8] sm:$0xff] }
  0x1e   :  { %374 = vmatpush3.msra.mxu0 %v43_v2  ;;  %385 = vmatpush3.msra.mxu1 %v142_v5  ;;  %v134_v15 = vld [vmem:[#allocation4 + $0xb0] sm:$0xff]  ;;  %v133_v16 = vld [vmem:[#allocation4 + $0xa8] sm:$0xff]  ;;  %v132_v17 = vld [vmem:[#allocation4 + $0xa0] sm:$0xff] }
  0x1f   :  { %375 = vmatprep.subr.mxu0 %v510_v0  ;;  %386 = vmatprep.subr.mxu1 %v510_v0  ;;  %v131_v18 = vld [vmem:[#allocation4 + $0x98] sm:$0xff]  ;;  %v130_v19 = vld [vmem:[#allocation4 + $0x90] sm:$0xff]  ;;  %v129_v20 = vld [vmem:[#allocation4 + $0x88] sm:$0xff] }
  0x20   :  { %376 = vmatpush3.msra.mxu0 %v42_v4  ;;  %387 = vmatpush3.msra.mxu1 %v141_v6  ;;  %v128_v21 = vld [vmem:[#allocation4 + $0x80] sm:$0xff]  ;;  %v239_v22 = vld [vmem:[#allocation4 + $0x178] sm:$0xff]  ;;  %v238_v23 = vld [vmem:[#allocation4 + $0x170] sm:$0xff] }
  0x21   :  { %377 = vmatprep.subr.mxu0 %v510_v0  ;;  %388 = vmatprep.subr.mxu1 %v510_v0  ;;  %v237_v24 = vld [vmem:[#allocation4 + $0x168] sm:$0xff]  ;;  %v236_v25 = vld [vmem:[#allocation4 + $0x160] sm:$0xff]  ;;  %v235_v26 = vld [vmem:[#allocation4 + $0x158] sm:$0xff] }
  0x22   :  { %378 = vmatpush3.msra.mxu0 %v41_v7  ;;  %389 = vmatpush3.msra.mxu1 %v140_v9  ;;  %v234_v27 = vld [vmem:[#allocation4 + $0x150] sm:$0xff]  ;;  %v233_v28 = vld [vmem:[#allocation4 + $0x148] sm:$0xff]  ;;  %v326_v29 = vld [vmem:[%s594_s2] ss:$0 sm:$0xff] }
  0x23   :  { %380 = vmatmul.mubr.msk.f32.vlgmr.msra.gmra.mxu0 %vm52_vm1, %v40_v8  ;;  %390 = vmatprep.subr.mxu1 %v510_v0  ;;  %v232_v34 = vld [vmem:[#allocation4 + $0x140] sm:$0xff]  ;;  %v231_v35 = vld [vmem:[#allocation4 + $0x138] sm:$0xff]  ;;  %v230_v36 = vld [vmem:[#allocation4 + $0x130] sm:$0xff] }
  0x24   :  { %417 = vmatprep.subr.mxu0 %v510_v0  ;;  %391 = vmatpush3.msra.mxu1 %v139_v10  ;;  %v229_v37 = vld [vmem:[#allocation4 + $0x128] sm:$0xff]  ;;  %v228_v38 = vld [vmem:[#allocation4 + $0x120] sm:$0xff]  ;;  %v227_v39 = vld [vmem:[#allocation4 + $0x118] sm:$0xff] }
  0x25   :  { %449 = vmatprep.mubr.msk.f32.mxu0 %vm511_vm0, %v510_v0  ;;  %392 = vmatprep.subr.mxu1 %v510_v0  ;;  %v226_v40 = vld [vmem:[#allocation4 + $0x110] sm:$0xff]  ;;  %v225_v41 = vld [vmem:[#allocation4 + $0x108] sm:$0xff]  ;;  %v224_v42 = vld [vmem:[#allocation4 + $0x100] sm:$0xff] }
  0x26   :  { %393 = vmatpush3.msra.mxu1 %v138_v11  ;;  %418 = vmatpush3.msra.mxu0 %v239_v22  ;;  %v329_v43 = vld [vmem:[%s594_s2 + $0x1] ss:$0 sm:$0xff]  ;;  %v331_v48 = vld [vmem:[%s594_s2 + $0x2] ss:$0 sm:$0xff] }
  0x27   :  { %394 = vmatprep.subr.mxu1 %v510_v0  ;;  %419 = vmatprep.subr.mxu0 %v510_v0 }
  0x28   :  { %395 = vmatpush3.msra.mxu1 %v137_v12  ;;  %420 = vmatpush3.msra.mxu0 %v238_v23 }
  0x29   :  { %396 = vmatprep.subr.mxu1 %v510_v0  ;;  %421 = vmatprep.subr.mxu0 %v510_v0 }
  0x2a   :  { %397 = vmatpush3.msra.mxu1 %v136_v13  ;;  %422 = vmatpush3.msra.mxu0 %v237_v24 }
  0x2b   :  { %398 = vmatprep.subr.mxu1 %v510_v0  ;;  %423 = vmatprep.subr.mxu0 %v510_v0 }
  0x2c   :  { %399 = vmatpush3.msra.mxu1 %v135_v14  ;;  %424 = vmatpush3.msra.mxu0 %v236_v25 }
  0x2d   :  { %400 = vmatprep.subr.mxu1 %v510_v0  ;;  %425 = vmatprep.subr.mxu0 %v510_v0 }
  0x2e   :  { %401 = vmatpush3.msra.mxu1 %v134_v15  ;;  %426 = vmatpush3.msra.mxu0 %v235_v26 }
  0x2f   :  { %402 = vmatprep.subr.mxu1 %v510_v0  ;;  %427 = vmatprep.subr.mxu0 %v510_v0 }
  0x30   :  { %403 = vmatpush3.msra.mxu1 %v133_v16  ;;  %428 = vmatpush3.msra.mxu0 %v234_v27 }
  0x31   :  { %404 = vmatprep.subr.mxu1 %v510_v0  ;;  %429 = vmatprep.subr.mxu0 %v510_v0 }
  0x32   :  { %405 = vmatpush3.msra.mxu1 %v132_v17  ;;  %430 = vmatpush3.msra.mxu0 %v233_v28 }
  0x33   :  { %406 = vmatprep.subr.mxu1 %v510_v0  ;;  %431 = vmatprep.subr.mxu0 %v510_v0 }
  0x34   :  { %407 = vmatpush3.msra.mxu1 %v131_v18  ;;  %432 = vmatpush3.msra.mxu0 %v232_v34 }
  0x35   :  { %408 = vmatprep.subr.mxu1 %v510_v0  ;;  %433 = vmatprep.subr.mxu0 %v510_v0 }
  0x36   :  { %409 = vmatpush3.msra.mxu1 %v130_v19  ;;  %434 = vmatpush3.msra.mxu0 %v231_v35 }
  0x37   :  { %410 = vmatprep.subr.mxu1 %v510_v0  ;;  %435 = vmatprep.subr.mxu0 %v510_v0 }
  0x38   :  { %411 = vmatpush3.msra.mxu1 %v129_v20  ;;  %436 = vmatpush3.msra.mxu0 %v230_v36 }
  0x39   :  { %412 = vmatprep.subr.mxu1 %v510_v0  ;;  %437 = vmatprep.subr.mxu0 %v510_v0 }
  0x3a   :  { %413 = vmatpush3.msra.mxu1 %v128_v21  ;;  %438 = vmatpush3.msra.mxu0 %v229_v37 }
  0x3b   :  { %439 = vmatprep.subr.mxu0 %v510_v0 }
  0x3c   :  { %440 = vmatpush3.msra.mxu0 %v228_v38 }
  0x3d   :  { %441 = vmatprep.subr.mxu0 %v510_v0 }
  0x3e   :  { %442 = vmatpush3.msra.mxu0 %v227_v39 }
  0x3f   :  { %443 = vmatprep.subr.mxu0 %v510_v0 }
  0x40   :  { %444 = vmatpush3.msra.mxu0 %v226_v40 }
  0x41   :  { %445 = vmatprep.subr.mxu0 %v510_v0 }
  0x42   :  { %446 = vmatpush3.msra.mxu0 %v225_v41 }
  0x43   :  { %447 = vmatprep.subr.mxu0 %v510_v0 }
  0x44   :  { %448 = vmatpush3.msra.mxu0 %v224_v42 }
  0xe3   :  { %v122_v30 = vpop.f32.mrf.mxu0 }
  0xe4   :  { %v123_v31 = vadd.f32 %v326_v29, %v122_v30 }
  0xe5   :  { %v381_v32 = vpop.f32.mrf.mxu0 }
  0xe6   :  { %458 = vtanh.f32 %v123_v31 }
  0xf3   :  { %v459_v33 = vpop.eup %458 }
  0xf4   :  { %415 = vmatmul.mubr.f32.vlgmr.msra.gmra.mxu1 %v459_v33 }
 0x1b4   :  { %v218_v44 = vpop.f32.mrf.mxu1 }
 0x1b5   :  { %v219_v45 = vadd.f32 %v329_v43, %v218_v44 }
 0x1b6   :  { %v416_v46 = vpop.f32.mrf.mxu1 }
 0x1b7   :  { %460 = vtanh.f32 %v219_v45 }
 0x1c4   :  { %v461_v47 = vpop.eup %460 }
 0x1c5   :  { %450 = vmatmul.mubr.f32.vlgmr.msra.gmra.mxu0 %v461_v47 }
 0x285   :  { %v314_v49 = vpop.f32.mrf.mxu0 }
 0x286   :  { %v315_v50 = vadd.f32 %v331_v48, %v314_v49 }
 0x287   :  { %v451_v51 = vpop.f32.mrf.mxu0 }
 0x288   :  { %319 = vst.msk [vmem:[%s595_s3] sm:$0xff] %vm318_vm2, %v315_v50 }
 0x289   :  { %324 = vsyncpa [#allocation3], 1 }
 0x28a   :  { %325 = vsyncpa [#allocation5], 1 }

</bundles_post_ra>
